<compile_context>
chip_gen: v7x
topology: tpu7x:2x2x1
jax: 0.10.0
libtpu: 0.0.40
codegen_flags: <defaults>
</compile_context>

<pallas_src>
import functools

import jax
import jax.numpy as jnp
from jax.experimental import pallas as pl
from jax.experimental.pallas import tpu as pltpu

LANE = 128      # lane width (last dim)
SUBLANE = 8     # sublane quantum (second-to-last dim, f32)


def _round_up(n, m):
    return ((n + m - 1) // m) * m


def _vae_kernel(x_ref, eps_ref,
                w_enc1, b_enc1, w_enc2, b_enc2,
                w_mu, b_mu, w_ls, b_ls,
                w_dec1, b_dec1, w_dec2, b_dec2,
                w_out, b_out,
                out_ref):
    """One batch tile of the full VAE forward. Weights are bf16, math accumulates f32."""
    cdt = w_enc1.dtype  # compute dtype for MXU inputs (bf16)

    def dense_relu(h, w_ref, b_ref):
        y = jnp.dot(h.astype(cdt), w_ref[...],
                    preferred_element_type=jnp.float32) + b_ref[...]
        return jnp.maximum(y, 0.0)

    # ---- encoder ----
    h = dense_relu(x_ref[...], w_enc1, b_enc1)
    h = dense_relu(h, w_enc2, b_enc2)

    # ---- latent projection: two lane-aligned matmuls instead of a lane-offset slice ----
    h_c = h.astype(cdt)
    mu = jnp.maximum(
        jnp.dot(h_c, w_mu[...], preferred_element_type=jnp.float32) + b_mu[...], 0.0)
    log_sigma = jnp.maximum(
        jnp.dot(h_c, w_ls[...], preferred_element_type=jnp.float32) + b_ls[...], 0.0)

    # ---- reparameterization (eps zero-padded past latent_dim => padded lanes stay 0) ----
    latent_r = mu + jnp.exp(log_sigma) * eps_ref[...]

    # ---- decoder ----
    d = dense_relu(latent_r, w_dec1, b_dec1)
    d = dense_relu(d, w_dec2, b_dec2)
    y = jnp.dot(d.astype(cdt), w_out[...],
                preferred_element_type=jnp.float32) + b_out[...]
    out_ref[...] = y.astype(out_ref.dtype)


def vae_forward(x, eps, params, latent_dim, *, tile_b=256,
                compute_dtype=jnp.bfloat16):
    """params: dict name -> (W [out,in], b [out]) in PyTorch nn.Linear convention."""
    batch, input_dim = x.shape
    layer_dim = params["enc1"][0].shape[0]
    output_dim = params["out"][0].shape[0]

    def pad_w(W):
        # torch [out, in] -> [in, out], zero-pad to [LANE, LANE], cast to compute dtype.
        Wt = jnp.asarray(W, jnp.float32).T
        Wt = jnp.pad(Wt, ((0, LANE - Wt.shape[0]), (0, LANE - Wt.shape[1])))
        return Wt.astype(compute_dtype)

    def pad_b(b):
        b = jnp.asarray(b, jnp.float32).reshape(1, -1)
        return jnp.pad(b, ((0, 0), (0, LANE - b.shape[1])))

    # Split the latent layer into mu / log_sigma halves (row split in torch layout).
    w_lat = jnp.asarray(params["latent"][0], jnp.float32)
    b_lat = jnp.asarray(params["latent"][1], jnp.float32)

    flat_args = [
        pad_w(params["enc1"][0]), pad_b(params["enc1"][1]),
        pad_w(params["enc2"][0]), pad_b(params["enc2"][1]),
        pad_w(w_lat[:latent_dim]), pad_b(b_lat[:latent_dim]),
        pad_w(w_lat[latent_dim:]), pad_b(b_lat[latent_dim:]),
        pad_w(params["dec1"][0]), pad_b(params["dec1"][1]),
        pad_w(params["dec2"][0]), pad_b(params["dec2"][1]),
        pad_w(params["out"][0]), pad_b(params["out"][1]),
    ]

    # ---- batch tiling ----
    tile_b = _round_up(tile_b, SUBLANE)
    tile_b = min(tile_b, max(SUBLANE, _round_up(batch, SUBLANE)))
    padded_batch = _round_up(batch, tile_b)
    grid = (padded_batch // tile_b,)

    x_p = jnp.pad(jnp.asarray(x, jnp.float32),
                  ((0, padded_batch - batch), (0, LANE - input_dim)))
    eps_p = jnp.pad(jnp.asarray(eps, jnp.float32),
                    ((0, padded_batch - batch), (0, LANE - latent_dim)))

    act_spec = pl.BlockSpec((tile_b, LANE), lambda i: (i, 0))
    w_spec = pl.BlockSpec((LANE, LANE), lambda i: (0, 0))   # resident across grid
    b_spec = pl.BlockSpec((1, LANE), lambda i: (0, 0))
    in_specs = [act_spec, act_spec] + [w_spec, b_spec] * 7

    flops = 2 * batch * (input_dim * layer_dim + layer_dim * layer_dim
                         + layer_dim * 2 * latent_dim + latent_dim * layer_dim
                         + layer_dim * layer_dim + layer_dim * output_dim)
    bytes_accessed = ((x_p.size + eps_p.size + padded_batch * LANE) * 4
                      + sum(int(a.size) * a.dtype.itemsize for a in flat_args))
    cost = pl.CostEstimate(flops=int(flops),
                           transcendentals=int(batch * latent_dim),
                           bytes_accessed=int(bytes_accessed))

    out_padded = pl.pallas_call(
        _vae_kernel,
        out_shape=jax.ShapeDtypeStruct((padded_batch, LANE), jnp.float32),
        grid_spec=pltpu.PrefetchScalarGridSpec(
            num_scalar_prefetch=0,
            grid=grid,
            in_specs=in_specs,
            out_specs=act_spec),
        compiler_params=pltpu.CompilerParams(
            dimension_semantics=("parallel",)),
        cost_estimate=cost,
    )(x_p, eps_p, *flat_args)

    return out_padded[:batch, :output_dim]


def init_linear(key, in_dim, out_dim):
    """Deterministic init mimicking nn.Linear default (uniform +/- 1/sqrt(in))."""
    kw, kb = jax.random.split(key)
    bound = 1.0 / jnp.sqrt(in_dim)
    W = jax.random.uniform(kw, (out_dim, in_dim), jnp.float32, -bound, bound)
    b = jax.random.uniform(kb, (out_dim,), jnp.float32, -bound, bound)
    return W, b


def reference_forward(x, eps, params, latent_dim):
    """Pure-JAX f32 reference mirroring the PyTorch module."""
    def lin(h, name):
        W, b = params[name]
        return h @ W.T + b
    z = jax.nn.relu(lin(x, "enc1"))
    z = jax.nn.relu(lin(z, "enc2"))
    z = jax.nn.relu(lin(z, "latent"))
    mu, log_sigma = z[:, :latent_dim], z[:, latent_dim:]
    latent_r = mu + jnp.exp(log_sigma) * eps
    h = jax.nn.relu(lin(latent_r, "dec1"))
    h = jax.nn.relu(lin(h, "dec2"))
    return lin(h, "out")


def reference_forward_bf16(x, eps, params, latent_dim, compute_dtype=jnp.bfloat16):
    """Reference that mimics the kernel's bf16-matmul / f32-accumulate numerics."""
    def lin(h, name):
        W, b = params[name]
        return jnp.dot(h.astype(compute_dtype), W.T.astype(compute_dtype),
                       preferred_element_type=jnp.float32) + b
    z = jax.nn.relu(lin(x, "enc1"))
    z = jax.nn.relu(lin(z, "enc2"))
    z = jax.nn.relu(lin(z, "latent"))
    mu, log_sigma = z[:, :latent_dim], z[:, latent_dim:]
    latent_r = mu + jnp.exp(log_sigma) * eps
    h = jax.nn.relu(lin(latent_r, "dec1"))
    h = jax.nn.relu(lin(h, "dec2"))
    return lin(h, "out")


if __name__ == "__main__":
    batch = 8
    input_dim = 16
    output_dim = 16
    latent_dim = 8
    layer_dim = 32

    root = jax.random.PRNGKey(0)
    keys = jax.random.split(root, 8)

    params = {
        "enc1":   init_linear(keys[0], input_dim, layer_dim),
        "enc2":   init_linear(keys[1], layer_dim, layer_dim),
        "latent": init_linear(keys[2], layer_dim, latent_dim * 2),
        "dec1":   init_linear(keys[3], latent_dim, layer_dim),
        "dec2":   init_linear(keys[4], layer_dim, layer_dim),
        "out":    init_linear(keys[5], layer_dim, output_dim),
    }

    x = jax.random.normal(keys[6], (batch, input_dim), jnp.float32)
    # eps plays the role of torch.randn(x.size(0), latent_dim), generated host-side.
    eps = jax.random.normal(keys[7], (batch, latent_dim), jnp.float32)

    out = vae_forward(x, eps, params, latent_dim)
    out = jax.block_until_ready(out)
    assert out.shape == (batch, output_dim)

    # Tight check against a reference that uses the same bf16-matmul numerics.
    ref_bf16 = reference_forward_bf16(x, eps, params, latent_dim)
    assert jnp.allclose(out, ref_bf16, atol=2e-3, rtol=2e-3), "mismatch vs bf16 reference"

    # Loose sanity check against the full-f32 PyTorch-equivalent reference.
    ref_f32 = reference_forward(x, eps, params, latent_dim)
    assert jnp.allclose(out, ref_f32, atol=5e-2, rtol=5e-2), "mismatch vs f32 reference"

    print("KERNEL_OK")
</pallas_src>

<mosaic_0001>
module attributes {stable_mosaic.version = 11 : i64} {
  func.func @_vae_kernel(%arg0: i32, %arg1: memref<8x128xf32, #tpu.memory_space<vmem>>, %arg2: memref<8x128xf32, #tpu.memory_space<vmem>>, %arg3: memref<128x128xbf16, #tpu.memory_space<vmem>>, %arg4: memref<1x128xf32, #tpu.memory_space<vmem>>, %arg5: memref<128x128xbf16, #tpu.memory_space<vmem>>, %arg6: memref<1x128xf32, #tpu.memory_space<vmem>>, %arg7: memref<128x128xbf16, #tpu.memory_space<vmem>>, %arg8: memref<1x128xf32, #tpu.memory_space<vmem>>, %arg9: memref<128x128xbf16, #tpu.memory_space<vmem>>, %arg10: memref<1x128xf32, #tpu.memory_space<vmem>>, %arg11: memref<128x128xbf16, #tpu.memory_space<vmem>>, %arg12: memref<1x128xf32, #tpu.memory_space<vmem>>, %arg13: memref<128x128xbf16, #tpu.memory_space<vmem>>, %arg14: memref<1x128xf32, #tpu.memory_space<vmem>>, %arg15: memref<128x128xbf16, #tpu.memory_space<vmem>>, %arg16: memref<1x128xf32, #tpu.memory_space<vmem>>, %arg17: memref<8x128xf32, #tpu.memory_space<vmem>>) attributes {dimension_semantics = [#tpu.dimension_semantics<parallel>], iteration_bounds = array<i64: 1>, scalar_prefetch = 0 : i64, scratch_operands = 0 : i64, tpu.core_type = #tpu.core_type<tc>, window_params = [{transform_indices = @transform_0, window_bounds = array<i64: 8, 128>}, {transform_indices = @transform_1, window_bounds = array<i64: 8, 128>}, {pipeline_mode = #tpu.pipeline_mode<synchronous>, transform_indices = @transform_2, window_bounds = array<i64: 128, 128>}, {pipeline_mode = #tpu.pipeline_mode<synchronous>, transform_indices = @transform_3, window_bounds = array<i64: 1, 128>}, {pipeline_mode = #tpu.pipeline_mode<synchronous>, transform_indices = @transform_4, window_bounds = array<i64: 128, 128>}, {pipeline_mode = #tpu.pipeline_mode<synchronous>, transform_indices = @transform_5, window_bounds = array<i64: 1, 128>}, {pipeline_mode = #tpu.pipeline_mode<synchronous>, transform_indices = @transform_6, window_bounds = array<i64: 128, 128>}, {pipeline_mode = #tpu.pipeline_mode<synchronous>, transform_indices = @transform_7, window_bounds = array<i64: 1, 128>}, {pipeline_mode = #tpu.pipeline_mode<synchronous>, transform_indices = @transform_8, window_bounds = array<i64: 128, 128>}, {pipeline_mode = #tpu.pipeline_mode<synchronous>, transform_indices = @transform_9, window_bounds = array<i64: 1, 128>}, {pipeline_mode = #tpu.pipeline_mode<synchronous>, transform_indices = @transform_10, window_bounds = array<i64: 128, 128>}, {pipeline_mode = #tpu.pipeline_mode<synchronous>, transform_indices = @transform_11, window_bounds = array<i64: 1, 128>}, {pipeline_mode = #tpu.pipeline_mode<synchronous>, transform_indices = @transform_12, window_bounds = array<i64: 128, 128>}, {pipeline_mode = #tpu.pipeline_mode<synchronous>, transform_indices = @transform_13, window_bounds = array<i64: 1, 128>}, {pipeline_mode = #tpu.pipeline_mode<synchronous>, transform_indices = @transform_14, window_bounds = array<i64: 128, 128>}, {pipeline_mode = #tpu.pipeline_mode<synchronous>, transform_indices = @transform_15, window_bounds = array<i64: 1, 128>}, {transform_indices = @transform_16, window_bounds = array<i64: 8, 128>}]} {
    %c0 = arith.constant 0 : index
    %c0_0 = arith.constant 0 : index
    %0 = vector.load %arg1[%c0, %c0_0] : memref<8x128xf32, #tpu.memory_space<vmem>>, vector<8x128xf32>
    %1 = arith.truncf %0 : vector<8x128xf32> to vector<8x128xbf16>
    %c0_1 = arith.constant 0 : index
    %c0_2 = arith.constant 0 : index
    %2 = vector.load %arg3[%c0_1, %c0_2] : memref<128x128xbf16, #tpu.memory_space<vmem>>, vector<128x128xbf16>
    %cst = arith.constant dense<0.000000e+00> : vector<8x128xf32>
    %3 = tpu.matmul %1, %2, %cst {dimension_numbers = #tpu.dot_dimension_numbers<[1], [0], [0], [1], [0, 0, 1, 1], [], []>} : vector<8x128xbf16>, vector<128x128xbf16>, vector<8x128xf32> -> vector<8x128xf32>
    %c0_3 = arith.constant 0 : index
    %c0_4 = arith.constant 0 : index
    %4 = vector.load %arg4[%c0_3, %c0_4] : memref<1x128xf32, #tpu.memory_space<vmem>>, vector<1x128xf32>
    %5 = vector.broadcast %4 : vector<1x128xf32> to vector<8x128xf32>
    %6 = arith.addf %3, %5 : vector<8x128xf32>
    %cst_5 = arith.constant 0.000000e+00 : f32
    %7 = vector.broadcast %cst_5 : f32 to vector<8x128xf32>
    %8 = arith.maximumf %6, %7 : vector<8x128xf32>
    %9 = arith.truncf %8 : vector<8x128xf32> to vector<8x128xbf16>
    %c0_6 = arith.constant 0 : index
    %c0_7 = arith.constant 0 : index
    %10 = vector.load %arg5[%c0_6, %c0_7] : memref<128x128xbf16, #tpu.memory_space<vmem>>, vector<128x128xbf16>
    %cst_8 = arith.constant dense<0.000000e+00> : vector<8x128xf32>
    %11 = tpu.matmul %9, %10, %cst_8 {dimension_numbers = #tpu.dot_dimension_numbers<[1], [0], [0], [1], [0, 0, 1, 1], [], []>} : vector<8x128xbf16>, vector<128x128xbf16>, vector<8x128xf32> -> vector<8x128xf32>
    %c0_9 = arith.constant 0 : index
    %c0_10 = arith.constant 0 : index
    %12 = vector.load %arg6[%c0_9, %c0_10] : memref<1x128xf32, #tpu.memory_space<vmem>>, vector<1x128xf32>
    %13 = vector.broadcast %12 : vector<1x128xf32> to vector<8x128xf32>
    %14 = arith.addf %11, %13 : vector<8x128xf32>
    %cst_11 = arith.constant 0.000000e+00 : f32
    %15 = vector.broadcast %cst_11 : f32 to vector<8x128xf32>
    %16 = arith.maximumf %14, %15 : vector<8x128xf32>
    %17 = arith.truncf %16 : vector<8x128xf32> to vector<8x128xbf16>
    %c0_12 = arith.constant 0 : index
    %c0_13 = arith.constant 0 : index
    %18 = vector.load %arg7[%c0_12, %c0_13] : memref<128x128xbf16, #tpu.memory_space<vmem>>, vector<128x128xbf16>
    %cst_14 = arith.constant dense<0.000000e+00> : vector<8x128xf32>
    %19 = tpu.matmul %17, %18, %cst_14 {dimension_numbers = #tpu.dot_dimension_numbers<[1], [0], [0], [1], [0, 0, 1, 1], [], []>} : vector<8x128xbf16>, vector<128x128xbf16>, vector<8x128xf32> -> vector<8x128xf32>
    %c0_15 = arith.constant 0 : index
    %c0_16 = arith.constant 0 : index
    %20 = vector.load %arg8[%c0_15, %c0_16] : memref<1x128xf32, #tpu.memory_space<vmem>>, vector<1x128xf32>
    %21 = vector.broadcast %20 : vector<1x128xf32> to vector<8x128xf32>
    %22 = arith.addf %19, %21 : vector<8x128xf32>
    %cst_17 = arith.constant 0.000000e+00 : f32
    %23 = vector.broadcast %cst_17 : f32 to vector<8x128xf32>
    %24 = arith.maximumf %22, %23 : vector<8x128xf32>
    %c0_18 = arith.constant 0 : index
    %c0_19 = arith.constant 0 : index
    %25 = vector.load %arg9[%c0_18, %c0_19] : memref<128x128xbf16, #tpu.memory_space<vmem>>, vector<128x128xbf16>
    %cst_20 = arith.constant dense<0.000000e+00> : vector<8x128xf32>
    %26 = tpu.matmul %17, %25, %cst_20 {dimension_numbers = #tpu.dot_dimension_numbers<[1], [0], [0], [1], [0, 0, 1, 1], [], []>} : vector<8x128xbf16>, vector<128x128xbf16>, vector<8x128xf32> -> vector<8x128xf32>
    %c0_21 = arith.constant 0 : index
    %c0_22 = arith.constant 0 : index
    %27 = vector.load %arg10[%c0_21, %c0_22] : memref<1x128xf32, #tpu.memory_space<vmem>>, vector<1x128xf32>
    %28 = vector.broadcast %27 : vector<1x128xf32> to vector<8x128xf32>
    %29 = arith.addf %26, %28 : vector<8x128xf32>
    %cst_23 = arith.constant 0.000000e+00 : f32
    %30 = vector.broadcast %cst_23 : f32 to vector<8x128xf32>
    %31 = arith.maximumf %29, %30 : vector<8x128xf32>
    %32 = math.exp %31 : vector<8x128xf32>
    %c0_24 = arith.constant 0 : index
    %c0_25 = arith.constant 0 : index
    %33 = vector.load %arg2[%c0_24, %c0_25] : memref<8x128xf32, #tpu.memory_space<vmem>>, vector<8x128xf32>
    %34 = arith.mulf %32, %33 : vector<8x128xf32>
    %35 = arith.addf %24, %34 : vector<8x128xf32>
    %36 = arith.truncf %35 : vector<8x128xf32> to vector<8x128xbf16>
    %c0_26 = arith.constant 0 : index
    %c0_27 = arith.constant 0 : index
    %37 = vector.load %arg11[%c0_26, %c0_27] : memref<128x128xbf16, #tpu.memory_space<vmem>>, vector<128x128xbf16>
    %cst_28 = arith.constant dense<0.000000e+00> : vector<8x128xf32>
    %38 = tpu.matmul %36, %37, %cst_28 {dimension_numbers = #tpu.dot_dimension_numbers<[1], [0], [0], [1], [0, 0, 1, 1], [], []>} : vector<8x128xbf16>, vector<128x128xbf16>, vector<8x128xf32> -> vector<8x128xf32>
    %c0_29 = arith.constant 0 : index
    %c0_30 = arith.constant 0 : index
    %39 = vector.load %arg12[%c0_29, %c0_30] : memref<1x128xf32, #tpu.memory_space<vmem>>, vector<1x128xf32>
    %40 = vector.broadcast %39 : vector<1x128xf32> to vector<8x128xf32>
    %41 = arith.addf %38, %40 : vector<8x128xf32>
    %cst_31 = arith.constant 0.000000e+00 : f32
    %42 = vector.broadcast %cst_31 : f32 to vector<8x128xf32>
    %43 = arith.maximumf %41, %42 : vector<8x128xf32>
    %44 = arith.truncf %43 : vector<8x128xf32> to vector<8x128xbf16>
    %c0_32 = arith.constant 0 : index
    %c0_33 = arith.constant 0 : index
    %45 = vector.load %arg13[%c0_32, %c0_33] : memref<128x128xbf16, #tpu.memory_space<vmem>>, vector<128x128xbf16>
    %cst_34 = arith.constant dense<0.000000e+00> : vector<8x128xf32>
    %46 = tpu.matmul %44, %45, %cst_34 {dimension_numbers = #tpu.dot_dimension_numbers<[1], [0], [0], [1], [0, 0, 1, 1], [], []>} : vector<8x128xbf16>, vector<128x128xbf16>, vector<8x128xf32> -> vector<8x128xf32>
    %c0_35 = arith.constant 0 : index
    %c0_36 = arith.constant 0 : index
    %47 = vector.load %arg14[%c0_35, %c0_36] : memref<1x128xf32, #tpu.memory_space<vmem>>, vector<1x128xf32>
    %48 = vector.broadcast %47 : vector<1x128xf32> to vector<8x128xf32>
    %49 = arith.addf %46, %48 : vector<8x128xf32>
    %cst_37 = arith.constant 0.000000e+00 : f32
    %50 = vector.broadcast %cst_37 : f32 to vector<8x128xf32>
    %51 = arith.maximumf %49, %50 : vector<8x128xf32>
    %52 = arith.truncf %51 : vector<8x128xf32> to vector<8x128xbf16>
    %c0_38 = arith.constant 0 : index
    %c0_39 = arith.constant 0 : index
    %53 = vector.load %arg15[%c0_38, %c0_39] : memref<128x128xbf16, #tpu.memory_space<vmem>>, vector<128x128xbf16>
    %cst_40 = arith.constant dense<0.000000e+00> : vector<8x128xf32>
    %54 = tpu.matmul %52, %53, %cst_40 {dimension_numbers = #tpu.dot_dimension_numbers<[1], [0], [0], [1], [0, 0, 1, 1], [], []>} : vector<8x128xbf16>, vector<128x128xbf16>, vector<8x128xf32> -> vector<8x128xf32>
    %c0_41 = arith.constant 0 : index
    %c0_42 = arith.constant 0 : index
    %55 = vector.load %arg16[%c0_41, %c0_42] : memref<1x128xf32, #tpu.memory_space<vmem>>, vector<1x128xf32>
    %56 = vector.broadcast %55 : vector<1x128xf32> to vector<8x128xf32>
    %57 = arith.addf %54, %56 : vector<8x128xf32>
    %c0_43 = arith.constant 0 : index
    %c0_44 = arith.constant 0 : index
    %58 = vector.load %arg17[%c0_43, %c0_44] : memref<8x128xf32, #tpu.memory_space<vmem>>, vector<8x128xf32>
    tpu.vector_store %arg17[%c0_43, %c0_44], %57 {strides = array<i32>} : memref<8x128xf32, #tpu.memory_space<vmem>>, vector<8x128xf32>,
    return
  }
  func.func @transform_0(%arg0: i32) -> (i32, i32) {
    %c0_i32 = arith.constant 0 : i32
    %c0_i32_0 = arith.constant 0 : i32
    return %arg0, %c0_i32 : i32, i32
  }
  func.func @transform_1(%arg0: i32) -> (i32, i32) {
    %c0_i32 = arith.constant 0 : i32
    %c0_i32_0 = arith.constant 0 : i32
    return %arg0, %c0_i32 : i32, i32
  }
  func.func @transform_2(%arg0: i32) -> (i32, i32) {
    %c0_i32 = arith.constant 0 : i32
    %c0_i32_0 = arith.constant 0 : i32
    %c0_i32_1 = arith.constant 0 : i32
    return %c0_i32, %c0_i32_0 : i32, i32
  }
  func.func @transform_3(%arg0: i32) -> (i32, i32) {
    %c0_i32 = arith.constant 0 : i32
    %c0_i32_0 = arith.constant 0 : i32
    %c0_i32_1 = arith.constant 0 : i32
    return %c0_i32, %c0_i32_0 : i32, i32
  }
  func.func @transform_4(%arg0: i32) -> (i32, i32) {
    %c0_i32 = arith.constant 0 : i32
    %c0_i32_0 = arith.constant 0 : i32
    %c0_i32_1 = arith.constant 0 : i32
    return %c0_i32, %c0_i32_0 : i32, i32
  }
  func.func @transform_5(%arg0: i32) -> (i32, i32) {
    %c0_i32 = arith.constant 0 : i32
    %c0_i32_0 = arith.constant 0 : i32
    %c0_i32_1 = arith.constant 0 : i32
    return %c0_i32, %c0_i32_0 : i32, i32
  }
  func.func @transform_6(%arg0: i32) -> (i32, i32) {
    %c0_i32 = arith.constant 0 : i32
    %c0_i32_0 = arith.constant 0 : i32
    %c0_i32_1 = arith.constant 0 : i32
    return %c0_i32, %c0_i32_0 : i32, i32
  }
  func.func @transform_7(%arg0: i32) -> (i32, i32) {
    %c0_i32 = arith.constant 0 : i32
    %c0_i32_0 = arith.constant 0 : i32
    %c0_i32_1 = arith.constant 0 : i32
    return %c0_i32, %c0_i32_0 : i32, i32
  }
  func.func @transform_8(%arg0: i32) -> (i32, i32) {
    %c0_i32 = arith.constant 0 : i32
    %c0_i32_0 = arith.constant 0 : i32
    %c0_i32_1 = arith.constant 0 : i32
    return %c0_i32, %c0_i32_0 : i32, i32
  }
  func.func @transform_9(%arg0: i32) -> (i32, i32) {
    %c0_i32 = arith.constant 0 : i32
    %c0_i32_0 = arith.constant 0 : i32
    %c0_i32_1 = arith.constant 0 : i32
    return %c0_i32, %c0_i32_0 : i32, i32
  }
  func.func @transform_10(%arg0: i32) -> (i32, i32) {
    %c0_i32 = arith.constant 0 : i32
    %c0_i32_0 = arith.constant 0 : i32
    %c0_i32_1 = arith.constant 0 : i32
    return %c0_i32, %c0_i32_0 : i32, i32
  }
  func.func @transform_11(%arg0: i32) -> (i32, i32) {
    %c0_i32 = arith.constant 0 : i32
    %c0_i32_0 = arith.constant 0 : i32
    %c0_i32_1 = arith.constant 0 : i32
    return %c0_i32, %c0_i32_0 : i32, i32
  }
  func.func @transform_12(%arg0: i32) -> (i32, i32) {
    %c0_i32 = arith.constant 0 : i32
    %c0_i32_0 = arith.constant 0 : i32
    %c0_i32_1 = arith.constant 0 : i32
    return %c0_i32, %c0_i32_0 : i32, i32
  }
  func.func @transform_13(%arg0: i32) -> (i32, i32) {
    %c0_i32 = arith.constant 0 : i32
    %c0_i32_0 = arith.constant 0 : i32
    %c0_i32_1 = arith.constant 0 : i32
    return %c0_i32, %c0_i32_0 : i32, i32
  }
  func.func @transform_14(%arg0: i32) -> (i32, i32) {
    %c0_i32 = arith.constant 0 : i32
    %c0_i32_0 = arith.constant 0 : i32
    %c0_i32_1 = arith.constant 0 : i32
    return %c0_i32, %c0_i32_0 : i32, i32
  }
  func.func @transform_15(%arg0: i32) -> (i32, i32) {
    %c0_i32 = arith.constant 0 : i32
    %c0_i32_0 = arith.constant 0 : i32
    %c0_i32_1 = arith.constant 0 : i32
    return %c0_i32, %c0_i32_0 : i32, i32
  }
  func.func @transform_16(%arg0: i32) -> (i32, i32) {
    %c0_i32 = arith.constant 0 : i32
    %c0_i32_0 = arith.constant 0 : i32
    return %arg0, %c0_i32 : i32, i32
  }
}

</mosaic_0001>

<bundles_post_ra>
// kernel: tpu_custom_call.1
= control target key start
LH: loop header
LB: loop body
LE: loop exit
PB: predicated region body
PF: predicated region fallthrough
CT: control target
= control target key end

     0   :  { %s1889_s0 = inlined_call_operand.hbm [shape: f32[8,128], index: 0, kind: input, shape index: {}]   ;;  %s1890_s1 = inlined_call_operand.hbm [shape: f32[8,128], index: 1, kind: input, shape index: {}]   ;;  %s1891_s2 = inlined_call_operand.hbm [shape: bf16[128,128], index: 2, kind: input, shape index: {}]   ;;  %s1892_s3 = inlined_call_operand.vmem [shape: f32[1,128], index: 3, kind: input, shape index: {}]   ;;  %s1893_s4 = inlined_call_operand.hbm [shape: bf16[128,128], index: 4, kind: input, shape index: {}]   ;;  %s1894_s5 = inlined_call_operand.vmem [shape: f32[1,128], index: 5, kind: input, shape index: {}]   ;;  %s1895_s6 = inlined_call_operand.hbm [shape: bf16[128,128], index: 6, kind: input, shape index: {}]   ;;  %s1896_s7 = inlined_call_operand.vmem [shape: f32[1,128], index: 7, kind: input, shape index: {}]   ;;  %s1897_s8 = inlined_call_operand.hbm [shape: bf16[128,128], index: 8, kind: input, shape index: {}]   ;;  %s1898_s9 = inlined_call_operand.vmem [shape: f32[1,128], index: 9, kind: input, shape index: {}]   ;;  %s1899_s10 = inlined_call_operand.hbm [shape: bf16[128,128], index: 10, kind: input, shape index: {}]   ;;  %s1900_s11 = inlined_call_operand.vmem [shape: f32[1,128], index: 11, kind: input, shape index: {}]   ;;  %s1901_s12 = inlined_call_operand.hbm [shape: bf16[128,128], index: 12, kind: input, shape index: {}]   ;;  %s1902_s13 = inlined_call_operand.vmem [shape: f32[1,128], index: 13, kind: input, shape index: {}]   ;;  %s1903_s14 = inlined_call_operand.hbm [shape: bf16[128,128], index: 14, kind: input, shape index: {}]   ;;  %s1904_s15 = inlined_call_operand.vmem [shape: f32[1,128], index: 15, kind: input, shape index: {}]   ;;  %s1905_s16 = inlined_call_operand.hbm [shape: f32[8,128], index: 16, kind: output, shape index: {}]  }
   0x1   :  { %1907 = sst [smem:[#allocation24_spill]] %s1889_s0 }
   0x2   :  { %21 = vsyncpa [#allocation3], 0 }
   0x3   :  { %22 = vsyncpa [#allocation6], 0 }
   0x4   :  { %23 = vsyncpa [#allocation9], 0 }
   0x5   :  { %24 = vsyncpa [#allocation12], 0 }
   0x6   :  { %25 = vsyncpa [#allocation15], 0 }
   0x7   :  { %26 = vsyncpa [#allocation4], 0  ;;  %s1558_s21 = smov [#allocation5]   ;;  %s1326_s25 = scalar_lea.hbm %s1890_s1, 128 }
   0x8   :  { %s43_s22 = sshll.u32 %s1558_s21, 4  ;;  %p1327_p0 = scmp.ne.s32.totalorder %s1890_s1, %s1326_s25  ;;  %s44_s22 = int_to_ptr.vmem [resolvable:$true] %s43_s22 }
   0x9   :  { %p1330_p1 = scmp.lt.u32.totalorder %s1326_s25, %s1890_s1 }
   0xb   :  { %p1332_p2 = pnand %p1330_p1, %p1327_p0 }
   0xd   :  { %1335 = shalt.err (!%p1332_p2)
}
   0xe   :  { %s1336_s30 = scalar_lea.vmem %s44_s22, 128  ;;  %p1341_p4 = scmp.lt.s32.totalorder %s44_s22, %s44_s22 }
   0xf   :  { %p1337_p3 = scmp.ne.s32.totalorder %s44_s22, %s1336_s30  ;;  %p1342_p5 = scmp.lt.s32.totalorder %s1336_s30, %s1336_s30 }
  0x11   :  { %p1343_p6 = por %p1342_p5, %p1341_p4 }
  0x13   :  { %p1344_p7 = pnand %p1343_p6, %p1337_p3 }
  0x15   :  { %1347 = shalt.err (!%p1344_p7)
}
  0x16   :  { %46 = dma.hbm_to_vmem [thread:$0]  %s1890_s1, 128, %s44_s22, [#allocation6]  }
  0x17   :  { %s1559_s18 = smov [#allocation8]   ;;  %s1560_s20 = smov [#allocation11]  }
  0x18   :  { %s66_s19 = sshll.u32 %s1559_s18, 4  ;;  %s94_s21 = sshll.u32 %s1560_s20, 4  ;;  %s67_s19 = int_to_ptr.vmem [resolvable:$true] %s66_s19  ;;  %s95_s21 = int_to_ptr.vmem [resolvable:$true] %s94_s21 }
  0x19   :  { %s1348_s25 = scalar_lea.hbm %s1893_s4, 1024 }
  0x1a   :  { %p1349_p8 = scmp.ne.s32.totalorder %s1893_s4, %s1348_s25  ;;  %p1352_p9 = scmp.lt.u32.totalorder %s1348_s25, %s1893_s4 }
  0x1c   :  { %p1354_p10 = pnand %p1352_p9, %p1349_p8 }
  0x1e   :  { %1357 = shalt.err (!%p1354_p10)
}
  0x1f   :  { %s1358_s1 = scalar_lea.vmem %s67_s19, 1024  ;;  %p1363_p12 = scmp.lt.s32.totalorder %s67_s19, %s67_s19 }
  0x20   :  { %p1359_p11 = scmp.ne.s32.totalorder %s67_s19, %s1358_s1  ;;  %p1364_p13 = scmp.lt.s32.totalorder %s1358_s1, %s1358_s1 }
  0x22   :  { %p1365_p0 = por %p1364_p13, %p1363_p12 }
  0x24   :  { %p1366_p1 = pnand %p1365_p0, %p1359_p11 }
  0x26   :  { %1369 = shalt.err (!%p1366_p1)
}
  0x27   :  { %s1561_s22 = smov 64   ;;  %s1562_s30 = smov 4  }
  0x28   :  { %72 = dma.hbm_to_vmem [thread:$0]  %s1893_s4, 1024, %s67_s19, [#allocation9], %s1561_s22, %s1561_s22, %s1562_s30  }
  0x29   :  { %s1370_s23 = scalar_lea.hbm %s1897_s8, 1024 }
  0x2a   :  { %p1371_p2 = scmp.ne.s32.totalorder %s1897_s8, %s1370_s23  ;;  %p1374_p3 = scmp.lt.u32.totalorder %s1370_s23, %s1897_s8 }
  0x2c   :  { %p1376_p4 = pnand %p1374_p3, %p1371_p2 }
  0x2e   :  { %1379 = shalt.err (!%p1376_p4)
}
  0x2f   :  { %s1380_s28 = scalar_lea.vmem %s95_s21, 1024  ;;  %p1385_p6 = scmp.lt.s32.totalorder %s95_s21, %s95_s21 }
  0x30   :  { %p1381_p5 = scmp.ne.s32.totalorder %s95_s21, %s1380_s28  ;;  %p1386_p7 = scmp.lt.s32.totalorder %s1380_s28, %s1380_s28 }
  0x32   :  { %p1387_p8 = por %p1386_p7, %p1385_p6 }
  0x34   :  { %p1388_p9 = pnand %p1387_p8, %p1381_p5 }
  0x36   :  { %1391 = shalt.err (!%p1388_p9)
}
  0x37   :  { %100 = dma.hbm_to_vmem [thread:$0]  %s1897_s8, 1024, %s95_s21, [#allocation12], %s1561_s22, %s1561_s22, %s1562_s30  }
  0x38   :  { %s1563_s29 = smov [#allocation14]   ;;  %s1564_s0 = smov [#allocation2]  }
  0x39   :  { %s122_s1 = sshll.u32 %s1563_s29, 4  ;;  %s33_s17 = sshll.u32 %s1564_s0, 4  ;;  %s123_s1 = int_to_ptr.vmem [resolvable:$true] %s122_s1  ;;  %s34_s17 = int_to_ptr.vmem [resolvable:$true] %s33_s17 }
  0x3a   :  { %s1392_s23 = scalar_lea.hbm %s1901_s12, 1024 }
  0x3b   :  { %p1393_p10 = scmp.ne.s32.totalorder %s1901_s12, %s1392_s23  ;;  %p1396_p11 = scmp.lt.u32.totalorder %s1392_s23, %s1901_s12 }
  0x3d   :  { %p1398_p12 = pnand %p1396_p11, %p1393_p10 }
  0x3f   :  { %1401 = shalt.err (!%p1398_p12)
}
  0x40   :  { %s1402_s8 = scalar_lea.vmem %s123_s1, 1024  ;;  %p1407_p0 = scmp.lt.s32.totalorder %s123_s1, %s123_s1 }
  0x41   :  { %p1403_p13 = scmp.ne.s32.totalorder %s123_s1, %s1402_s8  ;;  %p1408_p1 = scmp.lt.s32.totalorder %s1402_s8, %s1402_s8 }
  0x43   :  { %p1409_p2 = por %p1408_p1, %p1407_p0 }
  0x45   :  { %p1410_p3 = pnand %p1409_p2, %p1403_p13 }
  0x47   :  { %1413 = shalt.err (!%p1410_p3)
}
  0x48   :  { %128 = dma.hbm_to_vmem [thread:$0]  %s1901_s12, 1024, %s123_s1, [#allocation15], %s1561_s22, %s1561_s22, %s1562_s30  }
  0x49   :  { %s1908_s29 = sld [smem:[#allocation24_spill]] }
  0x4f   :  { %s1414_s0 = scalar_lea.hbm %s1908_s29, 128 }
  0x50   :  { %p1415_p4 = scmp.ne.s32.totalorder %s1908_s29, %s1414_s0  ;;  %p1418_p5 = scmp.lt.u32.totalorder %s1414_s0, %s1908_s29 }
  0x52   :  { %p1420_p6 = pnand %p1418_p5, %p1415_p4 }
  0x54   :  { %1423 = shalt.err (!%p1420_p6)
}
  0x55   :  { %s1424_s25 = scalar_lea.vmem %s34_s17, 128  ;;  %p1429_p8 = scmp.lt.s32.totalorder %s34_s17, %s34_s17 }
  0x56   :  { %p1425_p7 = scmp.ne.s32.totalorder %s34_s17, %s1424_s25  ;;  %p1430_p9 = scmp.lt.s32.totalorder %s1424_s25, %s1424_s25 }
  0x58   :  { %p1431_p10 = por %p1430_p9, %p1429_p8 }
  0x5a   :  { %p1432_p11 = pnand %p1431_p10, %p1425_p7 }
  0x5c   :  { %1435 = shalt.err (!%p1432_p11)
}
  0x5d   :  { %36 = dma.hbm_to_vmem [thread:$0]  %s1908_s29, 128, %s34_s17, [#allocation3]  }
  0x5e   :  { %s1565_s26 = smov [#allocation7]   ;;  %s1566_s8 = smov [#allocation10]  }
  0x5f   :  { %s52_s27 = sshll.u32 %s1565_s26, 4  ;;  %s80_s21 = sshll.u32 %s1566_s8, 4  ;;  %s53_s27 = int_to_ptr.vmem [resolvable:$true] %s52_s27  ;;  %s81_s21 = int_to_ptr.vmem [resolvable:$true] %s80_s21 }
  0x60   :  { %s1436_s19 = scalar_lea.hbm %s1891_s2, 1024 }
  0x61   :  { %p1437_p12 = scmp.ne.s32.totalorder %s1891_s2, %s1436_s19  ;;  %p1440_p13 = scmp.lt.u32.totalorder %s1436_s19, %s1891_s2 }
  0x63   :  { %p1442_p0 = pnand %p1440_p13, %p1437_p12 }
  0x65   :  { %1445 = shalt.err (!%p1442_p0)
}
  0x66   :  { %s1446_s17 = scalar_lea.vmem %s53_s27, 1024  ;;  %p1451_p2 = scmp.lt.s32.totalorder %s53_s27, %s53_s27 }
  0x67   :  { %p1447_p1 = scmp.ne.s32.totalorder %s53_s27, %s1446_s17  ;;  %p1452_p3 = scmp.lt.s32.totalorder %s1446_s17, %s1446_s17 }
  0x69   :  { %p1453_p4 = por %p1452_p3, %p1451_p2 }
  0x6b   :  { %p1454_p5 = pnand %p1453_p4, %p1447_p1 }
  0x6d   :  { %1457 = shalt.err (!%p1454_p5)
}
  0x6e   :  { %58 = dma.hbm_to_vmem [thread:$0]  %s1891_s2, 1024, %s53_s27, [#allocation6], %s1561_s22, %s1561_s22, %s1562_s30  }
  0x6f   :  { %s1458_s1 = scalar_lea.hbm %s1895_s6, 1024 }
  0x70   :  { %p1459_p6 = scmp.ne.s32.totalorder %s1895_s6, %s1458_s1  ;;  %p1462_p7 = scmp.lt.u32.totalorder %s1458_s1, %s1895_s6 }
  0x72   :  { %p1464_p8 = pnand %p1462_p7, %p1459_p6 }
  0x74   :  { %1467 = shalt.err (!%p1464_p8)
}
  0x75   :  { %s1468_s19 = scalar_lea.vmem %s81_s21, 1024  ;;  %p1473_p10 = scmp.lt.s32.totalorder %s81_s21, %s81_s21 }
  0x76   :  { %p1469_p9 = scmp.ne.s32.totalorder %s81_s21, %s1468_s19  ;;  %p1474_p11 = scmp.lt.s32.totalorder %s1468_s19, %s1468_s19 }
  0x78   :  { %p1475_p12 = por %p1474_p11, %p1473_p10 }
  0x7a   :  { %p1476_p13 = pnand %p1475_p12, %p1469_p9 }
  0x7c   :  { %1479 = shalt.err (!%p1476_p13)
}
  0x7d   :  { %86 = dma.hbm_to_vmem [thread:$0]  %s1895_s6, 1024, %s81_s21, [#allocation9], %s1561_s22, %s1561_s22, %s1562_s30  }
  0x7e   :  { %s1567_s0 = smov [#allocation13]   ;;  %s1568_s20 = smov [#allocation16]  }
  0x7f   :  { %s108_s18 = sshll.u32 %s1567_s0, 4  ;;  %s136_s23 = sshll.u32 %s1568_s20, 4  ;;  %s109_s18 = int_to_ptr.vmem [resolvable:$true] %s108_s18  ;;  %s137_s23 = int_to_ptr.vmem [resolvable:$true] %s136_s23 }
  0x80   :  { %s1480_s24 = scalar_lea.hbm %s1899_s10, 1024 }
  0x81   :  { %p1481_p0 = scmp.ne.s32.totalorder %s1899_s10, %s1480_s24  ;;  %p1484_p1 = scmp.lt.u32.totalorder %s1480_s24, %s1899_s10 }
  0x83   :  { %p1486_p2 = pnand %p1484_p1, %p1481_p0 }
  0x85   :  { %1489 = shalt.err (!%p1486_p2)
}
  0x86   :  { %s1490_s6 = scalar_lea.vmem %s109_s18, 1024  ;;  %p1495_p4 = scmp.lt.s32.totalorder %s109_s18, %s109_s18 }
  0x87   :  { %p1491_p3 = scmp.ne.s32.totalorder %s109_s18, %s1490_s6  ;;  %p1496_p5 = scmp.lt.s32.totalorder %s1490_s6, %s1490_s6 }
  0x89   :  { %p1497_p6 = por %p1496_p5, %p1495_p4 }
  0x8b   :  { %p1498_p7 = pnand %p1497_p6, %p1491_p3 }
  0x8d   :  { %1501 = shalt.err (!%p1498_p7)
}
  0x8e   :  { %114 = dma.hbm_to_vmem [thread:$0]  %s1899_s10, 1024, %s109_s18, [#allocation12], %s1561_s22, %s1561_s22, %s1562_s30  }
  0x8f   :  { %s1502_s19 = scalar_lea.hbm %s1903_s14, 1024 }
  0x90   :  { %p1503_p8 = scmp.ne.s32.totalorder %s1903_s14, %s1502_s19  ;;  %p1506_p9 = scmp.lt.u32.totalorder %s1502_s19, %s1903_s14 }
  0x92   :  { %p1508_p10 = pnand %p1506_p9, %p1503_p8 }
  0x94   :  { %1511 = shalt.err (!%p1508_p10)
}
  0x95   :  { %s1512_s17 = scalar_lea.vmem %s137_s23, 1024  ;;  %p1517_p12 = scmp.lt.s32.totalorder %s137_s23, %s137_s23 }
  0x96   :  { %p1513_p11 = scmp.ne.s32.totalorder %s137_s23, %s1512_s17  ;;  %p1518_p13 = scmp.lt.s32.totalorder %s1512_s17, %s1512_s17 }
  0x98   :  { %p1519_p0 = por %p1518_p13, %p1517_p12 }
  0x9a   :  { %p1520_p1 = pnand %p1519_p0, %p1513_p11 }
  0x9c   :  { %1523 = shalt.err (!%p1520_p1)
}
  0x9d   :  { %142 = dma.hbm_to_vmem [thread:$0]  %s1903_s14, 1024, %s137_s23, [#allocation15], %s1561_s22, %s1561_s22, %s1562_s30  }
  0x9e   :  { %1546 = dma.done.wait [#allocation3], 128  }
  0x9f   :  { %1547 = vsyncadd [#allocation3], 4294967168 }
  0xa0   :  { %1548 = dma.done.wait [#allocation6], 1152  }
  0xa1   :  { %1549 = vsyncadd [#allocation6], 4294966144 }
  0xa2   :  { %1550 = dma.done.wait [#allocation9], 2048  }
  0xa3   :  { %1551 = vsyncadd [#allocation9], 4294965248 }
  0xa4   :  { %1552 = dma.done.wait [#allocation12], 2048  }
  0xa5   :  { %1553 = vsyncadd [#allocation12], 4294965248 }
  0xa6   :  { %1554 = dma.done.wait [#allocation15], 2048  }
  0xa7   :  { %1555 = vsyncadd [#allocation15], 4294965248  ;;  %v1569_v0 = vmov 0.0   ;;  %vm1570_vm0 = vmmov 0   ;;  %v1268_v1 = vld [vmem:[#allocation7] sm:$0xff]   ;;  %v1269_v2 = vld [vmem:[#allocation7 + $0x8] sm:$0xff]  }
  0xa8   :  { %1114 = vmatprep.subr.bf16.mxu0 %v1569_v0  ;;  %1130 = vmatprep.mubr.msk.bf16.mxu0 %vm1570_vm0, %v1569_v0  ;;  %v1270_v3 = vld [vmem:[#allocation7 + $0x10] sm:$0xff]   ;;  %v1276_v4 = vld [vmem:[#allocation8] sm:$0xff]   ;;  %v1271_v5 = vld [vmem:[#allocation7 + $0x18] sm:$0xff]   ;;  %s1571_s26 = smov [#allocation17]  }
  0xa9   :  { %1134 = vmatprep.subr.bf16.mxu1 %v1569_v0  ;;  %1150 = vmatprep.mubr.msk.bf16.mxu1 %vm1570_vm0, %v1569_v0  ;;  %v1277_v6 = vld [vmem:[#allocation8 + $0x8] sm:$0xff]   ;;  %v1272_v7 = vld [vmem:[#allocation7 + $0x20] sm:$0xff]   ;;  %v1278_v8 = vld [vmem:[#allocation8 + $0x10] sm:$0xff]   ;;  %s975_s6 = sshll.u32 %s1571_s26, 4  ;;  %s976_s6 = int_to_ptr.vmem [resolvable:$true] %s975_s6 }
  0xaa   :  { %1115 = vmatpush3.bf16.msra.mxu0 %v1268_v1  ;;  %1135 = vmatpush3.bf16.msra.mxu1 %v1276_v4  ;;  %v1273_v9 = vld [vmem:[#allocation7 + $0x28] sm:$0xff]   ;;  %v1279_v10 = vld [vmem:[#allocation8 + $0x18] sm:$0xff]   ;;  %v1274_v11 = vld [vmem:[#allocation7 + $0x30] sm:$0xff]   ;;  %p1529_p3 = scmp.lt.s32.totalorder %s976_s6, %s976_s6 }
  0xab   :  { %1116 = vmatprep.subr.bf16.mxu0 %v1569_v0  ;;  %1136 = vmatprep.subr.bf16.mxu1 %v1569_v0  ;;  %v1280_v12 = vld [vmem:[#allocation8 + $0x20] sm:$0xff]   ;;  %v1275_v13 = vld [vmem:[#allocation7 + $0x38] sm:$0xff]   ;;  %v173_v14 = vld [vmem:[#allocation2] sm:$0xff] }
  0xac   :  { %v1281_v15 = vld [vmem:[#allocation8 + $0x28] sm:$0xff]   ;;  %v174_v16 = vpack.c.bf16 %v173_v14, %v173_v14  ;;  %v1282_v17 = vld [vmem:[#allocation8 + $0x30] sm:$0xff]   ;;  %v1283_v18 = vld [vmem:[#allocation8 + $0x38] sm:$0xff]  }
  0xad   :  { %v1284_v19 = vld [vmem:[#allocation10] sm:$0xff]   ;;  %v1286_v20 = vld [vmem:[#allocation10 + $0x8] sm:$0xff]   ;;  %v1288_v21 = vld [vmem:[#allocation10 + $0x10] sm:$0xff]  }
  0xae   :  { %1117 = vmatpush3.bf16.msra.mxu0 %v1269_v2  ;;  %1137 = vmatpush3.bf16.msra.mxu1 %v1277_v6  ;;  %v1290_v22 = vld [vmem:[#allocation10 + $0x18] sm:$0xff]   ;;  %v1292_v23 = vld [vmem:[#allocation10 + $0x20] sm:$0xff]   ;;  %v1294_v24 = vld [vmem:[#allocation10 + $0x28] sm:$0xff]  }
  0xaf   :  { %1118 = vmatprep.subr.bf16.mxu0 %v1569_v0  ;;  %1138 = vmatprep.subr.bf16.mxu1 %v1569_v0  ;;  %v988_v25 = vld [vmem:[%s1892_s3] ss:$0 sm:$0xff]  ;;  %v1285_v32 = vld [vmem:[#allocation11] sm:$0xff]   ;;  %v1287_v34 = vld [vmem:[#allocation11 + $0x8] sm:$0xff]  }
  0xb0   :  { %v1289_v35 = vld [vmem:[#allocation11 + $0x10] sm:$0xff]   ;;  %v1291_v36 = vld [vmem:[#allocation11 + $0x18] sm:$0xff]   ;;  %v1293_v37 = vld [vmem:[#allocation11 + $0x20] sm:$0xff]  }
  0xb1   :  { %v1295_v38 = vld [vmem:[#allocation11 + $0x28] sm:$0xff]   ;;  %v1296_v39 = vld [vmem:[#allocation10 + $0x30] sm:$0xff]   ;;  %v1298_v41 = vld [vmem:[#allocation10 + $0x38] sm:$0xff]  }
  0xb2   :  { %1119 = vmatpush3.bf16.msra.mxu0 %v1270_v3  ;;  %1139 = vmatpush3.bf16.msra.mxu1 %v1278_v8  ;;  %v1297_v40 = vld [vmem:[#allocation11 + $0x30] sm:$0xff]   ;;  %v1299_v42 = vld [vmem:[#allocation11 + $0x38] sm:$0xff]   ;;  %v1300_v50 = vld [vmem:[#allocation13] sm:$0xff]  }
  0xb3   :  { %1120 = vmatprep.subr.bf16.mxu0 %v1569_v0  ;;  %1140 = vmatprep.subr.bf16.mxu1 %v1569_v0  ;;  %v997_v43 = vld [vmem:[%s1894_s5] ss:$0 sm:$0xff]  ;;  %v1301_v52 = vld [vmem:[#allocation13 + $0x8] sm:$0xff]   ;;  %v1303_v54 = vld [vmem:[#allocation13 + $0x18] sm:$0xff]  }
  0xb4   :  { %v1302_v53 = vld [vmem:[#allocation13 + $0x10] sm:$0xff]   ;;  %v1304_v55 = vld [vmem:[#allocation13 + $0x20] sm:$0xff]   ;;  %v1305_v56 = vld [vmem:[#allocation13 + $0x28] sm:$0xff]  }
  0xb5   :  { %v1306_v57 = vld [vmem:[#allocation13 + $0x30] sm:$0xff]   ;;  %v1307_v58 = vld [vmem:[#allocation13 + $0x38] sm:$0xff]   ;;  %v1308_v59 = vld [vmem:[#allocation14] sm:$0xff]  }
  0xb6   :  { %1121 = vmatpush3.bf16.msra.mxu0 %v1271_v5  ;;  %1141 = vmatpush3.bf16.msra.mxu1 %v1279_v10  ;;  %v1309_v60 = vld [vmem:[#allocation14 + $0x8] sm:$0xff]   ;;  %v1310_v61 = vld [vmem:[#allocation14 + $0x10] sm:$0xff]   ;;  %v1311_v62 = vld [vmem:[#allocation14 + $0x18] sm:$0xff]  }
  0xb7   :  { %1122 = vmatprep.subr.bf16.mxu0 %v1569_v0  ;;  %1142 = vmatprep.subr.bf16.mxu1 %v1569_v0  ;;  %v1312_v63 = vld [vmem:[#allocation14 + $0x20] sm:$0xff]   ;;  %v1313_v1 = vld [vmem:[#allocation14 + $0x28] sm:$0xff]   ;;  %v1015_v2 = vld [vmem:[%s1898_s9] ss:$0 sm:$0xff] }
  0xb8   :  { %v1006_v14 = vld [vmem:[%s1896_s7] ss:$0 sm:$0xff] }
  0xba   :  { %1123 = vmatpush3.bf16.msra.mxu0 %v1272_v7  ;;  %1143 = vmatpush3.bf16.msra.mxu1 %v1280_v12 }
  0xbb   :  { %1124 = vmatprep.subr.bf16.mxu0 %v1569_v0  ;;  %1144 = vmatprep.subr.bf16.mxu1 %v1569_v0 }
  0xbe   :  { %1125 = vmatpush3.bf16.msra.mxu0 %v1273_v9  ;;  %1145 = vmatpush3.bf16.msra.mxu1 %v1281_v15 }
  0xbf   :  { %1126 = vmatprep.subr.bf16.mxu0 %v1569_v0  ;;  %1146 = vmatprep.subr.bf16.mxu1 %v1569_v0 }
  0xc2   :  { %1127 = vmatpush3.bf16.msra.mxu0 %v1274_v11  ;;  %1147 = vmatpush3.bf16.msra.mxu1 %v1282_v17 }
  0xc3   :  { %1128 = vmatprep.subr.bf16.mxu0 %v1569_v0  ;;  %1148 = vmatprep.subr.bf16.mxu1 %v1569_v0 }
  0xc6   :  { %1129 = vmatpush3.bf16.msra.mxu0 %v1275_v13  ;;  %1149 = vmatpush3.bf16.msra.mxu1 %v1283_v18 }
  0xc7   :  { %1154 = vmatprep.subr.bf16.mxu0 %v1569_v0  ;;  %1174 = vmatprep.subr.bf16.mxu1 %v1569_v0 }
  0xc9   :  { %1131 = vmatmul.mubr.bf16.vlgmr.msra.gmra.mrb[0].mxu0 %v174_v16  ;;  %v627_v16 = vld [vmem:[#allocation5] sm:$0xff] }
  0xca   :  { %1170 = vmatprep.mubr.msk.bf16.mxu0 %vm1570_vm0, %v1569_v0  ;;  %1155 = vmatpush3.bf16.msra.mxu0 %v1284_v19 }
  0xcb   :  { %1156 = vmatprep.subr.bf16.mxu0 %v1569_v0 }
  0xce   :  { %1157 = vmatpush3.bf16.msra.mxu0 %v1286_v20 }
  0xcf   :  { %1158 = vmatprep.subr.bf16.mxu0 %v1569_v0 }
  0xd2   :  { %1159 = vmatpush3.bf16.msra.mxu0 %v1288_v21 }
  0xd3   :  { %1160 = vmatprep.subr.bf16.mxu0 %v1569_v0 }
  0xd6   :  { %1161 = vmatpush3.bf16.msra.mxu0 %v1290_v22  ;;  %v1314_v22 = vld [vmem:[#allocation14 + $0x30] sm:$0xff]  }
  0xd7   :  { %1162 = vmatprep.subr.bf16.mxu0 %v1569_v0 }
  0xda   :  { %1163 = vmatpush3.bf16.msra.mxu0 %v1292_v23  ;;  %v1315_v23 = vld [vmem:[#allocation14 + $0x38] sm:$0xff]  }
  0xdb   :  { %1164 = vmatprep.subr.bf16.mxu0 %v1569_v0 }
  0xde   :  { %1165 = vmatpush3.bf16.msra.mxu0 %v1294_v24  ;;  %v1316_v24 = vld [vmem:[#allocation16] sm:$0xff]  }
  0xdf   :  { %1166 = vmatprep.subr.bf16.mxu0 %v1569_v0 }
  0xe2   :  { %1167 = vmatpush3.bf16.msra.mxu0 %v1296_v39  ;;  %v1323_v39 = vld [vmem:[#allocation16 + $0x38] sm:$0xff]  }
  0xe3   :  { %1168 = vmatprep.subr.bf16.mxu0 %v1569_v0 }
  0xe6   :  { %1169 = vmatpush3.bf16.msra.mxu0 %v1298_v41 }
  0xe7   :  { %1194 = vmatprep.subr.bf16.mxu0 %v1569_v0 }
 0x19c   :  { %v280_v26 = vpop.f32.mrb[0].mxu0 }
 0x19d   :  { %v281_v27 = vadd.f32 %v988_v25, %v280_v26  ;;  %v1132_v28 = vpop.f32.mrb[1].mxu0  ;;  %v1317_v25 = vld [vmem:[#allocation16 + $0x8] sm:$0xff]   ;;  %v1318_v26 = vld [vmem:[#allocation16 + $0x10] sm:$0xff]  }
 0x19e   :  { %v283_v29 = vpop.f32.mrb[2].mxu0  ;;  %v1320_v28 = vld [vmem:[#allocation16 + $0x20] sm:$0xff]  }
 0x19f   :  { %v286_v30 = vmax.f32 %v281_v27, 0.0  ;;  %v1133_v31 = vpop.f32.mrb[3].mxu0  ;;  %v1319_v27 = vld [vmem:[#allocation16 + $0x18] sm:$0xff]   ;;  %v1321_v29 = vld [vmem:[#allocation16 + $0x28] sm:$0xff]  }
 0x1a1   :  { %v287_v33 = vpack.c.bf16 %v286_v30, %v286_v30  ;;  %v1024_v30 = vld [vmem:[%s1900_s11] ss:$0 sm:$0xff] }
 0x1a3   :  { %1151 = vmatmul.mubr.bf16.vlgmr.msra.gmra.mrb[0].mxu1 %v287_v33 }
 0x1a4   :  { %1175 = vmatpush3.bf16.msra.mxu1 %v1285_v32  ;;  %1190 = vmatprep.mubr.msk.bf16.mxu1 %vm1570_vm0, %v1569_v0 }
 0x1a5   :  { %1176 = vmatprep.subr.bf16.mxu1 %v1569_v0 }
 0x1a8   :  { %1177 = vmatpush3.bf16.msra.mxu1 %v1287_v34 }
 0x1a9   :  { %1178 = vmatprep.subr.bf16.mxu1 %v1569_v0 }
 0x1ac   :  { %1179 = vmatpush3.bf16.msra.mxu1 %v1289_v35 }
 0x1ad   :  { %1180 = vmatprep.subr.bf16.mxu1 %v1569_v0 }
 0x1b0   :  { %1181 = vmatpush3.bf16.msra.mxu1 %v1291_v36 }
 0x1b1   :  { %1182 = vmatprep.subr.bf16.mxu1 %v1569_v0 }
 0x1b4   :  { %1183 = vmatpush3.bf16.msra.mxu1 %v1293_v37 }
 0x1b5   :  { %1184 = vmatprep.subr.bf16.mxu1 %v1569_v0 }
 0x1b8   :  { %1185 = vmatpush3.bf16.msra.mxu1 %v1295_v38  ;;  %v1322_v38 = vld [vmem:[#allocation16 + $0x30] sm:$0xff]  }
 0x1b9   :  { %1186 = vmatprep.subr.bf16.mxu1 %v1569_v0 }
 0x1bc   :  { %1187 = vmatpush3.bf16.msra.mxu1 %v1297_v40  ;;  %v1033_v40 = vld [vmem:[%s1902_s13] ss:$0 sm:$0xff]  ;;  %s1524_s13 = scalar_lea.vmem %s976_s6, 128 }
 0x1bd   :  { %1188 = vmatprep.subr.bf16.mxu1 %v1569_v0  ;;  %p1525_p2 = scmp.ne.s32.totalorder %s976_s6, %s1524_s13  ;;  %p1530_p4 = scmp.lt.s32.totalorder %s1524_s13, %s1524_s13 }
 0x1bf   :  { %p1531_p5 = por %p1530_p4, %p1529_p3 }
 0x1c0   :  { %1189 = vmatpush3.bf16.msra.mxu1 %v1299_v42 }
 0x1c1   :  { %1214 = vmatprep.subr.bf16.mxu1 %v1569_v0  ;;  %p1532_p6 = pnand %p1531_p5, %p1525_p2 }
 0x276   :  { %v393_v44 = vpop.f32.mrb[0].mxu1 }
 0x277   :  { %v394_v45 = vadd.f32 %v997_v43, %v393_v44  ;;  %v1152_v46 = vpop.f32.mrb[1].mxu1 }
 0x278   :  { %v396_v47 = vpop.f32.mrb[2].mxu1 }
 0x279   :  { %v399_v48 = vmax.f32 %v394_v45, 0.0  ;;  %v1153_v49 = vpop.f32.mrb[3].mxu1 }
 0x27b   :  { %v400_v51 = vpack.c.bf16 %v399_v48, %v399_v48  ;;  %v1042_v48 = vld [vmem:[%s1904_s15] ss:$0 sm:$0xff] }
 0x27d   :  { %1171 = vmatmul.mubr.bf16.vlgmr.msra.gmra.mrb[4].mxu0 %v400_v51  ;;  %1191 = vmatmul.mubr.bf16.vlgmr.msra.gmra.mrb[4].mxu1 %v400_v51 }
 0x27e   :  { %1195 = vmatpush3.bf16.msra.mxu0 %v1300_v50  ;;  %1210 = vmatprep.mubr.msk.bf16.mxu0 %vm1570_vm0, %v1569_v0 }
 0x27f   :  { %1196 = vmatprep.subr.bf16.mxu0 %v1569_v0  ;;  %1230 = vmatprep.mubr.msk.bf16.mxu1 %vm1570_vm0, %v1569_v0 }
 0x280   :  { %1215 = vmatpush3.bf16.msra.mxu1 %v1308_v59 }
 0x281   :  { %1216 = vmatprep.subr.bf16.mxu1 %v1569_v0 }
 0x282   :  { %1197 = vmatpush3.bf16.msra.mxu0 %v1301_v52 }
 0x283   :  { %1198 = vmatprep.subr.bf16.mxu0 %v1569_v0 }
 0x284   :  { %1217 = vmatpush3.bf16.msra.mxu1 %v1309_v60 }
 0x285   :  { %1218 = vmatprep.subr.bf16.mxu1 %v1569_v0 }
 0x286   :  { %1199 = vmatpush3.bf16.msra.mxu0 %v1302_v53 }
 0x287   :  { %1200 = vmatprep.subr.bf16.mxu0 %v1569_v0 }
 0x288   :  { %1219 = vmatpush3.bf16.msra.mxu1 %v1310_v61 }
 0x289   :  { %1220 = vmatprep.subr.bf16.mxu1 %v1569_v0 }
 0x28a   :  { %1201 = vmatpush3.bf16.msra.mxu0 %v1303_v54 }
 0x28b   :  { %1202 = vmatprep.subr.bf16.mxu0 %v1569_v0 }
 0x28c   :  { %1221 = vmatpush3.bf16.msra.mxu1 %v1311_v62 }
 0x28d   :  { %1222 = vmatprep.subr.bf16.mxu1 %v1569_v0 }
 0x28e   :  { %1203 = vmatpush3.bf16.msra.mxu0 %v1304_v55 }
 0x28f   :  { %1204 = vmatprep.subr.bf16.mxu0 %v1569_v0 }
 0x290   :  { %1223 = vmatpush3.bf16.msra.mxu1 %v1312_v63 }
 0x291   :  { %1224 = vmatprep.subr.bf16.mxu1 %v1569_v0 }
 0x292   :  { %1205 = vmatpush3.bf16.msra.mxu0 %v1305_v56 }
 0x293   :  { %1206 = vmatprep.subr.bf16.mxu0 %v1569_v0 }
 0x294   :  { %1225 = vmatpush3.bf16.msra.mxu1 %v1313_v1 }
 0x295   :  { %1226 = vmatprep.subr.bf16.mxu1 %v1569_v0 }
 0x296   :  { %1207 = vmatpush3.bf16.msra.mxu0 %v1306_v57 }
 0x297   :  { %1208 = vmatprep.subr.bf16.mxu0 %v1569_v0 }
 0x298   :  { %1227 = vmatpush3.bf16.msra.mxu1 %v1314_v22 }
 0x299   :  { %1228 = vmatprep.subr.bf16.mxu1 %v1569_v0 }
 0x29a   :  { %1209 = vmatpush3.bf16.msra.mxu0 %v1307_v58 }
 0x29b   :  { %1234 = vmatprep.subr.bf16.mxu0 %v1569_v0 }
 0x29c   :  { %1229 = vmatpush3.bf16.msra.mxu1 %v1315_v23 }
 0x350   :  { %v506_v3 = vpop.f32.mrb[4].mxu0  ;;  %v618_v4 = vpop.f32.mrb[4].mxu1 }
 0x351   :  { %v619_v5 = vadd.f32 %v1015_v2, %v618_v4  ;;  %v1172_v6 = vpop.f32.mrb[5].mxu0  ;;  %v1192_v7 = vpop.f32.mrb[5].mxu1  ;;  %v507_v15 = vadd.f32 %v1006_v14, %v506_v3 }
 0x352   :  { %v509_v8 = vpop.f32.mrb[6].mxu0  ;;  %v621_v9 = vpop.f32.mrb[6].mxu1 }
 0x353   :  { %v624_v10 = vmax.f32 %v619_v5, 0.0  ;;  %v1173_v11 = vpop.f32.mrb[7].mxu0  ;;  %v1193_v12 = vpop.f32.mrb[7].mxu1  ;;  %v512_v18 = vmax.f32 %v507_v15, 0.0 }
 0x355   :  { %v625_v13 = vmul.f32 1.442695, %v624_v10 }
 0x357   :  { %1324 = vpow2.f32 %v625_v13 }
 0x361   :  { %v1325_v17 = vpop.eup %1324 }
 0x362   :  { %v628_v19 = vmul.f32 %v1325_v17, %v627_v16 }
 0x364   :  { %v629_v20 = vadd.f32 %v628_v19, %v512_v18 }
 0x366   :  { %v630_v21 = vpack.c.bf16 %v629_v20, %v629_v20 }
 0x368   :  { %1211 = vmatmul.mubr.bf16.vlgmr.msra.gmra.mrb[8].mxu0 %v630_v21 }
 0x369   :  { %1250 = vmatprep.mubr.msk.bf16.mxu0 %vm1570_vm0, %v1569_v0  ;;  %1235 = vmatpush3.bf16.msra.mxu0 %v1316_v24 }
 0x36a   :  { %1236 = vmatprep.subr.bf16.mxu0 %v1569_v0 }
 0x36d   :  { %1237 = vmatpush3.bf16.msra.mxu0 %v1317_v25 }
 0x36e   :  { %1238 = vmatprep.subr.bf16.mxu0 %v1569_v0 }
 0x371   :  { %1239 = vmatpush3.bf16.msra.mxu0 %v1318_v26 }
 0x372   :  { %1240 = vmatprep.subr.bf16.mxu0 %v1569_v0 }
 0x375   :  { %1241 = vmatpush3.bf16.msra.mxu0 %v1319_v27 }
 0x376   :  { %1242 = vmatprep.subr.bf16.mxu0 %v1569_v0 }
 0x379   :  { %1243 = vmatpush3.bf16.msra.mxu0 %v1320_v28 }
 0x37a   :  { %1244 = vmatprep.subr.bf16.mxu0 %v1569_v0 }
 0x37d   :  { %1245 = vmatpush3.bf16.msra.mxu0 %v1321_v29 }
 0x37e   :  { %1246 = vmatprep.subr.bf16.mxu0 %v1569_v0 }
 0x381   :  { %1247 = vmatpush3.bf16.msra.mxu0 %v1322_v38 }
 0x382   :  { %1248 = vmatprep.subr.bf16.mxu0 %v1569_v0 }
 0x385   :  { %1249 = vmatpush3.bf16.msra.mxu0 %v1323_v39 }
 0x43b   :  { %v736_v31 = vpop.f32.mrb[8].mxu0 }
 0x43c   :  { %v737_v32 = vadd.f32 %v1024_v30, %v736_v31  ;;  %v1212_v33 = vpop.f32.mrb[9].mxu0 }
 0x43d   :  { %v739_v34 = vpop.f32.mrb[10].mxu0 }
 0x43e   :  { %v742_v35 = vmax.f32 %v737_v32, 0.0  ;;  %v1213_v36 = vpop.f32.mrb[11].mxu0 }
 0x440   :  { %v743_v37 = vpack.c.bf16 %v742_v35, %v742_v35 }
 0x442   :  { %1231 = vmatmul.mubr.bf16.vlgmr.msra.gmra.mrb[8].mxu1 %v743_v37 }
 0x515   :  { %v849_v41 = vpop.f32.mrb[8].mxu1 }
 0x516   :  { %v850_v42 = vadd.f32 %v1033_v40, %v849_v41  ;;  %v1232_v43 = vpop.f32.mrb[9].mxu1 }
 0x517   :  { %v852_v44 = vpop.f32.mrb[10].mxu1 }
 0x518   :  { %v855_v45 = vmax.f32 %v850_v42, 0.0  ;;  %v1233_v46 = vpop.f32.mrb[11].mxu1 }
 0x51a   :  { %v856_v47 = vpack.c.bf16 %v855_v45, %v855_v45 }
 0x51c   :  { %1251 = vmatmul.mubr.bf16.vlgmr.msra.gmra.mrb[12].mxu0 %v856_v47 }
 0x5ef   :  { %v962_v0 = vpop.f32.mrb[12].mxu0 }
 0x5f0   :  { %v963_v49 = vadd.f32 %v1042_v48, %v962_v0  ;;  %v1252_v50 = vpop.f32.mrb[13].mxu0 }
 0x5f1   :  { %v965_v51 = vpop.f32.mrb[14].mxu0 }
 0x5f2   :  { %968 = vst [vmem:[#allocation17] sm:$0xff] %v963_v49  ;;  %v1253_v52 = vpop.f32.mrb[15].mxu0 }
 0x5f3   :  { %1535 = shalt.err (!%p1532_p6)
}
 0x5f4   :  { %s1536_s15 = scalar_lea.hbm %s1905_s16, 128 }
 0x5f5   :  { %p1537_p7 = scmp.ne.s32.totalorder %s1905_s16, %s1536_s15  ;;  %p1540_p8 = scmp.lt.u32.totalorder %s1536_s15, %s1905_s16 }
 0x5f7   :  { %p1542_p9 = pnand %p1540_p8, %p1537_p7 }
 0x5f9   :  { %1545 = shalt.err (!%p1542_p9)
}
 0x5fa   :  { %978 = dma.vmem_to_hbm [thread:$0]  %s976_s6, 128, %s1905_s16, [#allocation4]  }
 0x5fb   :  { %1556 = dma.done.wait [#allocation4], 128  }
 0x5fc   :  { %1557 = vsyncadd [#allocation4], 4294967168 }
 0x5fd   :  { %982 = vsyncpa [#allocation3], 1 }
 0x5fe   :  { %983 = vsyncpa [#allocation6], 1 }
 0x5ff   :  { %984 = vsyncpa [#allocation9], 1 }
 0x600   :  { %985 = vsyncpa [#allocation12], 1 }
 0x601   :  { %986 = vsyncpa [#allocation15], 1 }
 0x602   :  { %987 = vsyncpa [#allocation4], 1 }

</bundles_post_ra>
